<compile_context>
chip_gen: v5e
topology: v5e:2x2
jax: 0.10.0
libtpu: 0.0.40
codegen_flags: <defaults>
</compile_context>

<pallas_src>
import functools
import math

import jax
import jax.numpy as jnp
from jax import lax
from jax.experimental import pallas as pl
from jax.experimental.pallas import tpu as pltpu


_VMEM_LIMIT_BYTES = 48 * 1024 * 1024  # <= 64 MiB physical on v7x, plenty on v5e/v6e


def _gelu(x):
    # OpenAI-GPT / BERT tanh approximation of GELU (matches the PyTorch code).
    return 0.5 * x * (1.0 + jnp.tanh(math.sqrt(2.0 / math.pi)
                                     * (x + 0.044715 * x * x * x)))


def _scatter_linear_kernel(tok_ref, hid_ref, wt_ref, b_ref, cell_ref, *,
                           m_pad, compute_dtype):
    # tok_ref : (1, 1, TS) int32 (lane-major ids)   hid_ref : (1, TS, H) f32
    # wt_ref  : (H, H) f32 (already transposed)     b_ref   : (1, H) f32
    # cell_ref: (1, M_pad, H) f32 output block, revisited across the S axis.
    s_idx = pl.program_id(1)

    @pl.when(s_idx == 0)
    def _():
        cell_ref[...] = jnp.zeros_like(cell_ref)

    tok = tok_ref[0]                                   # (1, TS) int32
    hid = hid_ref[0]                                   # (TS, H) f32
    ts = hid.shape[0]

    # One-hot built directly in (M_pad, TS) orientation -> scatter matmul needs
    # no transpose (contraction over the trailing LHS dim / leading RHS dim).
    iota_m = lax.broadcasted_iota(jnp.int32, (m_pad, ts), 0)
    oh_mt = (iota_m == tok).astype(compute_dtype)      # (M_pad, TS)

    cell_ref[0] += jnp.dot(oh_mt, hid.astype(compute_dtype),
                           preferred_element_type=jnp.float32)

    @pl.when(s_idx == pl.num_programs(1) - 1)
    def _():
        # Linear + GELU applied once per batch, after the full scatter-sum.
        # (For very large H the (H, H) weight could be tiled over output-H or
        #  stored in bf16; kept whole+f32 here for exactness at moderate H.)
        proj = jnp.dot(cell_ref[0], wt_ref[...],
                       preferred_element_type=jnp.float32) + b_ref[...]
        cell_ref[0] = _gelu(proj)


def _gather_kernel(tok_ref, cell_ref, out_ref, *, m_pad, compute_dtype):
    # tok_ref : (1, TS, 1) int32 (sublane-major ids)   cell_ref : (1, M_pad, H) f32
    # out_ref : (1, TS, H) f32
    tok = tok_ref[0]                                   # (TS, 1) int32
    ts = tok.shape[0]

    iota_m = lax.broadcasted_iota(jnp.int32, (ts, m_pad), 1)
    oh_sm = (iota_m == tok).astype(compute_dtype)      # (TS, M_pad)

    out_ref[0] = jnp.dot(oh_sm, cell_ref[0].astype(compute_dtype),
                         preferred_element_type=jnp.float32).astype(out_ref.dtype)


def _choose_seq_tile(S):
    for ts in (512, 256, 128):
        if S % ts == 0:
            return ts
    return S  # small / irregular S: single tile (lane-dim rule satisfied by TS == S)


def projection_layer_forward(hidden_states, token_type_ids, weight, bias,
                             max_length=256, *, seq_tile=None,
                             compute_dtype=jnp.float32):
    """hidden_states: (B, S, H) f32, token_type_ids: (B, S) int, weight: (H, H),
    bias: (H,). Returns seq_hidden: (B, S, H) f32."""
    B, S, H = hidden_states.shape
    M = int(max_length)
    m_pad = max(128, ((M + 127) // 128) * 128)          # lane-pad max_length

    ts = seq_tile if seq_tile is not None else _choose_seq_tile(S)
    assert S % ts == 0, "seq_tile must divide S"
    n_s = S // ts

    hid = hidden_states.astype(jnp.float32)
    wt = weight.T.astype(jnp.float32)                   # kernel does x @ wt + b
    b2 = bias.reshape(1, H).astype(jnp.float32)
    tok = token_type_ids.astype(jnp.int32)
    tok_lanes = tok.reshape(B, 1, S)                    # lane-major (phase 1)
    tok_subl = tok.reshape(B, S, 1)                     # sublane-major (phase 2)

    # ---------------- Phase 1: scatter-sum + linear + GELU -> cell (B, M_pad, H)
    cell = pl.pallas_call(
        functools.partial(_scatter_linear_kernel, m_pad=m_pad,
                          compute_dtype=compute_dtype),
        out_shape=jax.ShapeDtypeStruct((B, m_pad, H), jnp.float32),
        grid=(B, n_s),
        in_specs=[
            pl.BlockSpec((1, 1, ts), lambda b, s: (b, 0, s)),   # token ids
            pl.BlockSpec((1, ts, H), lambda b, s: (b, s, 0)),   # hidden tile
            pl.BlockSpec((H, H), lambda b, s: (0, 0)),          # weight^T (resident)
            pl.BlockSpec((1, H), lambda b, s: (0, 0)),          # bias (resident)
        ],
        out_specs=pl.BlockSpec((1, m_pad, H), lambda b, s: (b, 0, 0)),
        compiler_params=pltpu.CompilerParams(
            dimension_semantics=("parallel", "arbitrary"),
            vmem_limit_bytes=_VMEM_LIMIT_BYTES),
    )(tok_lanes, hid, wt, b2)

    # ---------------- Phase 2: gather -> seq_hidden (B, S, H)
    seq = pl.pallas_call(
        functools.partial(_gather_kernel, m_pad=m_pad,
                          compute_dtype=compute_dtype),
        out_shape=jax.ShapeDtypeStruct((B, S, H), jnp.float32),
        grid=(B, n_s),
        in_specs=[
            pl.BlockSpec((1, ts, 1), lambda b, s: (b, s, 0)),     # token ids
            pl.BlockSpec((1, m_pad, H), lambda b, s: (b, 0, 0)),  # cell (resident)
        ],
        out_specs=pl.BlockSpec((1, ts, H), lambda b, s: (b, s, 0)),
        compiler_params=pltpu.CompilerParams(
            dimension_semantics=("parallel", "parallel"),
            vmem_limit_bytes=_VMEM_LIMIT_BYTES),
    )(tok_subl, cell)
    return seq


def _reference_forward(hidden_states, token_type_ids, weight, bias, max_length):
    hp = lax.Precision.HIGHEST
    one_hot_to = jax.nn.one_hot(token_type_ids, max_length, dtype=jnp.float32)
    cell = jnp.einsum('bsm,bsh->bmh', one_hot_to, hidden_states, precision=hp)
    proj = jnp.einsum('bmh,hk->bmk', cell, weight.T, precision=hp) + bias
    cell = _gelu(proj)
    return jnp.einsum('bsm,bmh->bsh', one_hot_to, cell, precision=hp)


if __name__ == "__main__":
    # Small shapes consistent with the module's forward; seq_tile=128 forces
    # two S tiles so the accumulate / finalize paths are exercised.
    B, S, H, MAX_LEN = 2, 256, 128, 64

    key = jax.random.PRNGKey(0)
    k_hid, k_tok, k_w, k_b = jax.random.split(key, 4)

    hidden_states = jax.random.normal(k_hid, (B, S, H), dtype=jnp.float32)
    token_type_ids = jax.random.randint(k_tok, (B, S), 0, MAX_LEN, dtype=jnp.int32)

    # Deterministic nn.Linear(H, H)-style init: U(-1/sqrt(H), 1/sqrt(H)).
    bound = 1.0 / math.sqrt(H)
    weight = jax.random.uniform(k_w, (H, H), jnp.float32, -bound, bound)
    bias = jax.random.uniform(k_b, (H,), jnp.float32, -bound, bound)

    out = projection_layer_forward(hidden_states, token_type_ids, weight, bias,
                                   max_length=MAX_LEN, seq_tile=128)
    out = jax.block_until_ready(out)

    ref = _reference_forward(hidden_states, token_type_ids, weight, bias, MAX_LEN)
    assert out.shape == (B, S, H)
    assert jnp.allclose(out, ref, rtol=1e-4, atol=1e-4), "mismatch vs reference"

    print("KERNEL_OK")
</pallas_src>

<mosaic_0001>
module attributes {stable_mosaic.version = 11 : i64} {
  func.func @_scatter_linear_kernel(%arg0: i32, %arg1: i32, %arg2: memref<1x1x128xi32, #tpu.memory_space<vmem>>, %arg3: memref<1x128x128xf32, #tpu.memory_space<vmem>>, %arg4: memref<128x128xf32, #tpu.memory_space<vmem>>, %arg5: memref<1x128xf32, #tpu.memory_space<vmem>>, %arg6: memref<1x128x128xf32, #tpu.memory_space<vmem>>) attributes {dimension_semantics = [#tpu.dimension_semantics<parallel>, #tpu.dimension_semantics<arbitrary>], iteration_bounds = array<i64: 2, 2>, scalar_prefetch = 0 : i64, scratch_operands = 0 : i64, tpu.core_type = #tpu.core_type<tc>, window_params = [{transform_indices = @transform_0, window_bounds = array<i64: 1, 1, 128>}, {transform_indices = @transform_1, window_bounds = array<i64: 1, 128, 128>}, {pipeline_mode = #tpu.pipeline_mode<synchronous>, transform_indices = @transform_2, window_bounds = array<i64: 128, 128>}, {pipeline_mode = #tpu.pipeline_mode<synchronous>, transform_indices = @transform_3, window_bounds = array<i64: 1, 128>}, {transform_indices = @transform_4, window_bounds = array<i64: 1, 128, 128>}]} {
    %c0_i32 = arith.constant 0 : i32
    %0 = arith.cmpi eq, %arg1, %c0_i32 : i32
    %1 = arith.extui %0 : i1 to i32
    %c0_i32_0 = arith.constant 0 : i32
    %2 = arith.cmpi ne, %1, %c0_i32_0 : i32
    scf.if %2 {
      %cst_13 = arith.constant 0.000000e+00 : f32
      %22 = vector.broadcast %cst_13 : f32 to vector<1x128x128xf32>
      %c0_14 = arith.constant 0 : index
      %c0_15 = arith.constant 0 : index
      %c0_16 = arith.constant 0 : index
      %23 = vector.load %arg6[%c0_14, %c0_15, %c0_16] : memref<1x128x128xf32, #tpu.memory_space<vmem>>, vector<1x128x128xf32>
      tpu.vector_store %arg6[%c0_14, %c0_15, %c0_16], %22 {strides = array<i32>} : memref<1x128x128xf32, #tpu.memory_space<vmem>>, vector<1x128x128xf32>,
    } else {
    }
    %c0 = arith.constant 0 : index
    %c0_1 = arith.constant 0 : index
    %c0_2 = arith.constant 0 : index
    %3 = vector.load %arg2[%c0, %c0_1, %c0_2] : memref<1x1x128xi32, #tpu.memory_space<vmem>>, vector<1x1x128xi32>
    %4 = vector.shape_cast %3 : vector<1x1x128xi32> to vector<1x128xi32>
    %c0_3 = arith.constant 0 : index
    %c0_4 = arith.constant 0 : index
    %c0_5 = arith.constant 0 : index
    %5 = vector.load %arg3[%c0_3, %c0_4, %c0_5] : memref<1x128x128xf32, #tpu.memory_space<vmem>>, vector<1x128x128xf32>
    %6 = vector.shape_cast %5 : vector<1x128x128xf32> to vector<128x128xf32>
    %7 = tpu.iota {dimensions = array<i32: 0>} : vector<128x128xi32>
    %8 = vector.broadcast %4 : vector<1x128xi32> to vector<128x128xi32>
    %9 = arith.cmpi eq, %7, %8 : vector<128x128xi32>
    %10 = arith.extui %9 : vector<128x128xi1> to vector<128x128xi32>
    %11 = arith.sitofp %10 : vector<128x128xi32> to vector<128x128xf32>
    %c0_6 = arith.constant 0 : index
    %c0_7 = arith.constant 0 : index
    %c0_8 = arith.constant 0 : index
    %12 = vector.load %arg6[%c0_6, %c0_7, %c0_8] : memref<1x128x128xf32, #tpu.memory_space<vmem>>, vector<1x128x128xf32>
    %13 = vector.shape_cast %12 : vector<1x128x128xf32> to vector<128x128xf32>
    %cst = arith.constant dense<0.000000e+00> : vector<128x128xf32>
    %14 = tpu.matmul %11, %6, %cst {dimension_numbers = #tpu.dot_dimension_numbers<[1], [0], [0], [1], [0, 0, 1, 1], [], []>} : vector<128x128xf32>, vector<128x128xf32>, vector<128x128xf32> -> vector<128x128xf32>
    %15 = arith.addf %13, %14 : vector<128x128xf32>
    %c0_9 = arith.constant 0 : index
    %c0_10 = arith.constant 0 : index
    %c0_11 = arith.constant 0 : index
    %16 = vector.load %arg6[%c0_9, %c0_10, %c0_11] : memref<1x128x128xf32, #tpu.memory_space<vmem>>, vector<1x128x128xf32>
    %17 = vector.shape_cast %16 : vector<1x128x128xf32> to vector<128x128xf32>
    %18 = vector.shape_cast %15 : vector<128x128xf32> to vector<1x128x128xf32>
    tpu.vector_store %arg6[%c0_9, %c0_10, %c0_11], %18 {strides = array<i32>} : memref<1x128x128xf32, #tpu.memory_space<vmem>>, vector<1x128x128xf32>,
    %c1_i32 = arith.constant 1 : i32
    %19 = arith.cmpi eq, %arg1, %c1_i32 : i32
    %20 = arith.extui %19 : i1 to i32
    %c0_i32_12 = arith.constant 0 : i32
    %21 = arith.cmpi ne, %20, %c0_i32_12 : i32
    scf.if %21 {
      %c0_13 = arith.constant 0 : index
      %c0_14 = arith.constant 0 : index
      %c0_15 = arith.constant 0 : index
      %22 = vector.load %arg6[%c0_13, %c0_14, %c0_15] : memref<1x128x128xf32, #tpu.memory_space<vmem>>, vector<1x128x128xf32>
      %23 = vector.shape_cast %22 : vector<1x128x128xf32> to vector<128x128xf32>
      %c0_16 = arith.constant 0 : index
      %c0_17 = arith.constant 0 : index
      %24 = vector.load %arg4[%c0_16, %c0_17] : memref<128x128xf32, #tpu.memory_space<vmem>>, vector<128x128xf32>
      %cst_18 = arith.constant dense<0.000000e+00> : vector<128x128xf32>
      %25 = tpu.matmul %23, %24, %cst_18 {dimension_numbers = #tpu.dot_dimension_numbers<[1], [0], [0], [1], [0, 0, 1, 1], [], []>} : vector<128x128xf32>, vector<128x128xf32>, vector<128x128xf32> -> vector<128x128xf32>
      %c0_19 = arith.constant 0 : index
      %c0_20 = arith.constant 0 : index
      %26 = vector.load %arg5[%c0_19, %c0_20] : memref<1x128xf32, #tpu.memory_space<vmem>>, vector<1x128xf32>
      %27 = vector.broadcast %26 : vector<1x128xf32> to vector<128x128xf32>
      %28 = arith.addf %25, %27 : vector<128x128xf32>
      %cst_21 = arith.constant 5.000000e-01 : f32
      %29 = vector.broadcast %cst_21 : f32 to vector<128x128xf32>
      %30 = arith.mulf %29, %28 : vector<128x128xf32>
      %cst_22 = arith.constant 4.471500e-02 : f32
      %31 = vector.broadcast %cst_22 : f32 to vector<128x128xf32>
      %32 = arith.mulf %31, %28 : vector<128x128xf32>
      %33 = arith.mulf %32, %28 : vector<128x128xf32>
      %34 = arith.mulf %33, %28 : vector<128x128xf32>
      %35 = arith.addf %28, %34 : vector<128x128xf32>
      %cst_23 = arith.constant 0.797884583 : f32
      %36 = vector.broadcast %cst_23 : f32 to vector<128x128xf32>
      %37 = arith.mulf %36, %35 : vector<128x128xf32>
      %38 = math.tanh %37 : vector<128x128xf32>
      %cst_24 = arith.constant 1.000000e+00 : f32
      %39 = vector.broadcast %cst_24 : f32 to vector<128x128xf32>
      %40 = arith.addf %39, %38 : vector<128x128xf32>
      %41 = arith.mulf %30, %40 : vector<128x128xf32>
      %c0_25 = arith.constant 0 : index
      %c0_26 = arith.constant 0 : index
      %c0_27 = arith.constant 0 : index
      %42 = vector.load %arg6[%c0_25, %c0_26, %c0_27] : memref<1x128x128xf32, #tpu.memory_space<vmem>>, vector<1x128x128xf32>
      %43 = vector.shape_cast %42 : vector<1x128x128xf32> to vector<128x128xf32>
      %44 = vector.shape_cast %41 : vector<128x128xf32> to vector<1x128x128xf32>
      tpu.vector_store %arg6[%c0_25, %c0_26, %c0_27], %44 {strides = array<i32>} : memref<1x128x128xf32, #tpu.memory_space<vmem>>, vector<1x128x128xf32>,
    } else {
    }
    return
  }
  func.func @transform_0(%arg0: i32, %arg1: i32) -> (i32, i32, i32) {
    %c0_i32 = arith.constant 0 : i32
    %c0_i32_0 = arith.constant 0 : i32
    return %arg0, %c0_i32, %arg1 : i32, i32, i32
  }
  func.func @transform_1(%arg0: i32, %arg1: i32) -> (i32, i32, i32) {
    %c0_i32 = arith.constant 0 : i32
    %c0_i32_0 = arith.constant 0 : i32
    return %arg0, %arg1, %c0_i32 : i32, i32, i32
  }
  func.func @transform_2(%arg0: i32, %arg1: i32) -> (i32, i32) {
    %c0_i32 = arith.constant 0 : i32
    %c0_i32_0 = arith.constant 0 : i32
    %c0_i32_1 = arith.constant 0 : i32
    return %c0_i32, %c0_i32_0 : i32, i32
  }
  func.func @transform_3(%arg0: i32, %arg1: i32) -> (i32, i32) {
    %c0_i32 = arith.constant 0 : i32
    %c0_i32_0 = arith.constant 0 : i32
    %c0_i32_1 = arith.constant 0 : i32
    return %c0_i32, %c0_i32_0 : i32, i32
  }
  func.func @transform_4(%arg0: i32, %arg1: i32) -> (i32, i32, i32) {
    %c0_i32 = arith.constant 0 : i32
    %c0_i32_0 = arith.constant 0 : i32
    %c0_i32_1 = arith.constant 0 : i32
    return %arg0, %c0_i32, %c0_i32_0 : i32, i32, i32
  }
}

</mosaic_0001>

<bundles_post_ra>
// kernel: tpu_custom_call.1
= control target key start
LH: loop header
LB: loop body
LE: loop exit
PB: predicated region body
PF: predicated region fallthrough
CT: control target
= control target key end

     0   :  { %s1940_s0 = inlined_call_operand.hbm [shape: s32[2,1,256], index: 0, kind: input, shape index: {}]   ;;  %s1941_s1 = inlined_call_operand.hbm [shape: f32[2,256,128], index: 1, kind: input, shape index: {}]   ;;  %s1942_s2 = inlined_call_operand.hbm [shape: f32[128,128], index: 2, kind: input, shape index: {}]   ;;  %s1943_s3 = inlined_call_operand.vmem [shape: f32[1,128], index: 3, kind: input, shape index: {}]   ;;  %s1944_s4 = inlined_call_operand.hbm [shape: f32[2,128,128], index: 4, kind: output, shape index: {}]  }
   0x1   :  { %1955 = sst [smem:[#allocation22_spill]] %s1940_s0 }
   0x2   :  { %1956 = sst [smem:[#allocation23_spill]] %s1942_s2 }
   0x3   :  { %1957 = sst [smem:[#allocation24_spill]] %s1944_s4 }
   0x4   :  { %9 = vsyncpa [#allocation3], 0 }
   0x5   :  { %11 = vsyncpa [#allocation3 + $0x1], 0 }
   0x6   :  { %12 = vsyncpa [#allocation6], 0 }
   0x7   :  { %14 = vsyncpa [#allocation6 + $0x1], 0 }
   0x8   :  { %15 = vsyncpa [#allocation4], 0 }
   0x9   :  { %17 = vsyncpa [#allocation4 + $0x1], 0  ;;  %s1466_s15 = smov 0   ;;  %s1468_s16 = smov 0  }
   0xa   :  { %s1470_s17 = smov 0   ;;  %s1472_s18 = smov 0  }
   0xb   :  { %s1474_s19 = smov 0   ;;  %s1476_s20 = smov 0  }
   0xc   :  { %s1478_s21 = smov 0   ;;  %s1480_s22 = smov 0  }
   0xd   :  { %s1482_s23 = smov 0   ;;  %s1484_s24 = smov 0  }
   0xe   :  { %s1486_s25 = smov 0  }
   0xf LB: > { %1958 = sst [smem:[#allocation13_spill]] %s1392_s15  ;;  %s1522_s26 = sadd.s32 4294967295, %s1432_s25   ;;  %s1432_s25 = sphi %s1486_s25, %s23_s25   ;;  %s1428_s24 = sphi %s1484_s24, %s1995_s24   ;;  %s1424_s23 = sphi %s1482_s23, %s1994_s23   ;;  %s1420_s22 = sphi %s1480_s22, %s1993_s22   ;;  %s1416_s21 = sphi %s1478_s21, %s1992_s21   ;;  %s1412_s20 = sphi %s1476_s20, %s1984_s20   ;;  %s1408_s19 = sphi %s1474_s19, %s1991_s19   ;;  %s1404_s18 = sphi %s1472_s18, %s1990_s18   ;;  %s1400_s17 = sphi %s1470_s17, %s1989_s17   ;;  %s1396_s16 = sphi %s1468_s16, %s1988_s16   ;;  %s1392_s15 = sphi %s1466_s15, %s1987_s15  }
  0x10   : > { %1959 = sst [smem:[#allocation14_spill]] %s1412_s20  ;;  %s905_s27 = sadd.s32 4294967294, %s1432_s25  }
  0x11   : > { %1960 = sst [smem:[#allocation15_spill]] %s1420_s22  ;;  %p58_p0 = scmp.eq.s32.totalorder %s1522_s26, 0 }
  0x12   : > { %p150_p1 = scmp.ne.s32.totalorder %s1400_s17, %s1396_s16  ;;  %p151_p2 = scmp.eq.s32.totalorder %s1522_s26, 3 }
  0x13   : > { %p156_p3 = scmp.ne.s32.totalorder %s1396_s16, %s1392_s15  ;;  %p157_p4 = scmp.eq.s32.totalorder %s905_s27, 3 }
  0x14   : > { %p906_p5 = scmp.ge.s32.totalorder %s1432_s25, 1  ;;  %p1532_p6 = por %p151_p2, %p150_p1 }
  0x15   : > { %p164_p7 = scmp.lt.s32.totalorder %s1432_s25, 5  ;;  %p1537_p8 = por %p157_p4, %p156_p3 }
  0x16   : > { %s1961_s28 = scalar_select %p1532_p6, 1, 0 }
  0x17   : > { %s1963_s29 = scalar_select %p1537_p8, 1, 0 }
  0x18   : > { %1962 = sst [smem:[#allocation16_spill]] %s1961_s28  ;;  %p1541_p9 = pnand %p906_p5, %p164_p7 }
  0x19   : > { %1964 = sst [smem:[#allocation17_spill]] %s1963_s29  ;;  %s1434_s8 = smov [#allocation7]  }
  0x1a   : > { %s1966_s2 = sld [smem:[#allocation23_spill]]  ;;  %p1064_p10 = pneg %p1541_p9 }
  0x1b   : > { %s177_s9 = sshll.u32 %s1434_s8, 4  ;;  %s1945_s10 = smov 128   ;;  %s178_s9 = int_to_ptr.vmem [resolvable:$true] %s177_s9 }
  0x1c   : > { %p1065_p11 = pnand %p1064_p10, %p58_p0  ;;  %s1946_s11 = smov 8  }
  0x1d   : > { %s32_s12 = sadd.s32 1, %s1424_s23  ;;  %s35_s13 = sadd.s32 1, %s1428_s24 }
  0x1e   : > { %p33_p12 = scmp.ge.s32.totalorder %s32_s12, 2  ;;  %s44_s14 = sadd.s32 1, %s1412_s20 }
  0x1f   : > { %p51_p13 = scmp.ne.s32.totalorder %s1412_s20, %s1408_s19  ;;  %p52_p1 = scmp.eq.s32.totalorder %s1432_s25, 0 }
  0x20   : > { %s175_s7 = sshll.u32 %s1966_s2, 4  ;;  %s1997_s12 = smov (%p33_p12, %s32_s12), 0  ;;  %s176_s7 = int_to_ptr.hbm [resolvable:$true] %s175_s7 }
  0x21   : > { %1067 = dma.hbm_to_vmem [thread:$0]  (!%p1065_p11), %s176_s7, 2048, %s178_s9, [#allocation6], %s1945_s10, %s1945_s10, %s1946_s11  }
  0x22   : > { %1967 = sst [smem:[#allocation18_spill]] %s1997_s12  ;;  %s1999_s13 = smov (!%p33_p12, %s35_s13), %s1428_s24 }
  0x23   : > { %s40_s27 = ssub.s32 %s1424_s23, %s1997_s12  ;;  %p1566_p2 = por %p52_p1, %p51_p13 }
  0x24   : > { %p37_p3 = scmp.ge.s32.totalorder %s1999_s13, 2  ;;  %p57_p4 = scmp.ne.s32.totalorder %s1408_s19, %s1404_s18 }
  0x25   : > { %s140_s6 = sadd.s32 1, %s1400_s17  ;;  %p1080_p5 = scmp.lt.s32.totalorder %s1432_s25, 4 }
  0x26   : > { %s2001_s13 = smov (%p37_p3, %s1999_s13), 0  ;;  %p1578_p7 = por %p58_p0, %p57_p4 }
  0x27   : > { %1969 = sst [smem:[#allocation19_spill]] %s2001_s13  ;;  %s194_s8 = sand.u32 1, %s1412_s20  }
  0x28   : > { %s39_s9 = ssub.s32 %s1428_s24, %s2001_s13  ;;  %s909_s2 = sshll.u32 %s1428_s24, 1 }
  0x29   : > { %s41_s10 = sor.u32 %s40_s27, %s39_s9  ;;  %p138_p10 = scmp.eq.s32.totalorder %s39_s9, 0 }
  0x2a   : > { %p42_p11 = scmp.eq.s32.totalorder %s41_s10, 0  ;;  %s197_s12 = scalar_lea.vmem [#allocation2], %s194_s8 }
  0x2b   : > { %s1586_s11 = scalar_select %p138_p10, %s1400_s17, %s140_s6  }
  0x2c   : > { %s1589_s18 = scalar_select %p42_p11, %s1412_s20, %s44_s14  }
  0x2d   : > { %1971 = sst [smem:[#allocation20_spill]] %s1586_s11  ;;  %s206_s29 = sshll.u32 %s197_s12, 4  ;;  %s207_s29 = int_to_ptr.vmem [resolvable:$true] %s206_s29 }
  0x2e   : > { %1972 = sst [smem:[#allocation21_spill]] %s1589_s18  ;;  %s201_s15 = sadd.s32 %s1424_s23, %s909_s2 }
  0x2f   : > { %s1973_s0 = sld [smem:[#allocation22_spill]]  ;;  %p1600_p12 = pnand %p1080_p5, %p1566_p2 }
  0x30   : > { %s910_s14 = sshll.u32 %s194_s8, 7  ;;  %s195_s6 = scalar_lea.sflag [#allocation3], %s194_s8 }
  0x31   : > { %s911_s2 = sshll.u32 %s1424_s23, 4  ;;  %s217_s12 = scalar_lea.vmem [#allocation5], %s910_s14 }
  0x32   : > { %s227_s9 = sshll.u32 %s217_s12, 4  ;;  %s213_s13 = sand.u32 1, %s1432_s25   ;;  %s228_s9 = int_to_ptr.vmem [resolvable:$true] %s227_s9 }
  0x33   : > { %s912_s4 = sshll.u32 %s1428_s24, 5  ;;  %s1975_s11 = smov 8  }
  0x34   : > { %s1976_s8 = smov 128  }
  0x35   : > { %s202_s22 = scalar_lea.hbm %s1973_s0, %s201_s15  ;;  %s222_s15 = sadd.s32 %s912_s4, %s911_s2 }
  0x36   : > { %s204_s10 = sshll.u32 %s202_s22, 4  ;;  %s913_s28 = sshll.u32 %s222_s15, 3  ;;  %s205_s10 = int_to_ptr.hbm [resolvable:$true] %s204_s10 }
  0x37   : > { %1071 = dma.hbm_to_vmem [thread:$0]  (!%p1600_p12), %s205_s10, 16, %s207_s29, %s195_s6  }
  0x38   : > { %s224_s18 = scalar_lea.hbm %s1941_s1, %s913_s28  ;;  %s214_s22 = scalar_lea.sflag [#allocation6], %s213_s13 }
  0x39   : > { %s225_s20 = sshll.u32 %s224_s18, 4  ;;  %239 = sbr.rel (%p1541_p9) target bundleno = 524 (0x20c), region = 36  ;;  %s226_s20 = int_to_ptr.hbm [resolvable:$true] %s225_s20 }
  0x3a   : > { %1074 = dma.hbm_to_vmem [thread:$0]  (!%p1600_p12), %s226_s20, 2048, %s228_s9, %s214_s22, %s1976_s8, %s1976_s8, %s1975_s11  }
  0x3b   : > { %s1620_s29 = sand.u32 (!%p1541_p9), 1, %s1408_s19  }
  0x3c   : > { %s242_s10 = scalar_lea.sflag (!%p1541_p9), [#allocation3], %s1620_s29  ;;  %s244_s0 = scalar_lea.vmem (!%p1541_p9), [#allocation2], %s1620_s29 }
  0x3e   : > { %1375 = dma.done.wait (%p1578_p7), %s242_s10, 16  }
  0x3f   : > { %1377 = vsyncadd (%p1578_p7), %s242_s10, 4294967280  ;;  %s250_s20 = sand.u32 1, %s1522_s26   ;;  %s915_s11 = sshll.u32 %s1620_s29, 7 }
  0x40   : > { %s251_s30 = scalar_lea.sflag [#allocation6], %s250_s20  ;;  %s1630_s13 = scalar_lea.vmem [#allocation5], %s915_s11 }
  0x41   : > { %1379 = dma.done.wait (%p1578_p7), %s251_s30, 2048  }
  0x42   : > { %1381 = vsyncadd (%p1578_p7), %s251_s30, 4294965248 }
  0x43   : > { %1383 = dma.done.wait (%p58_p0), [#allocation6], 2048  }
  0x44   : > { %1385 = vsyncadd (%p58_p0), [#allocation6], 4294965248  ;;  %s286_s18 = sand.u32 1, %s1396_s16   ;;  %p918_p9 = scmp.ne.s32.totalorder %s1416_s21, 0 }
  0x45   : > { %s917_s27 = sshll.u32 %s286_s18, 7 }
  0x46   : > { %s1643_s14 = scalar_lea.vmem [#allocation8], %s917_s27  ;;  %293 = sbr.rel (%p918_p9) target bundleno = 92 (0x5c), region = 52 }
  0x4b   : > { %v1437_v0 = vmov 0.0  }
  0x4c   : > { %294 = vst [vmem:[%s1643_s14] sm:$0xff] %v1437_v0 }
  0x4d   : > { %295 = vst [vmem:[%s1643_s14 + $0x8] sm:$0xff] %v1437_v0 }
  0x4e   : > { %296 = vst [vmem:[%s1643_s14 + $0x10] sm:$0xff] %v1437_v0 }
  0x4f   : > { %297 = vst [vmem:[%s1643_s14 + $0x18] sm:$0xff] %v1437_v0 }
  0x50   : > { %298 = vst [vmem:[%s1643_s14 + $0x20] sm:$0xff] %v1437_v0 }
  0x51   : > { %299 = vst [vmem:[%s1643_s14 + $0x28] sm:$0xff] %v1437_v0 }
  0x52   : > { %300 = vst [vmem:[%s1643_s14 + $0x30] sm:$0xff] %v1437_v0 }
  0x53   : > { %301 = vst [vmem:[%s1643_s14 + $0x38] sm:$0xff] %v1437_v0 }
  0x54   : > { %302 = vst [vmem:[%s1643_s14 + $0x40] sm:$0xff] %v1437_v0 }
  0x55   : > { %303 = vst [vmem:[%s1643_s14 + $0x48] sm:$0xff] %v1437_v0 }
  0x56   : > { %304 = vst [vmem:[%s1643_s14 + $0x50] sm:$0xff] %v1437_v0 }
  0x57   : > { %305 = vst [vmem:[%s1643_s14 + $0x58] sm:$0xff] %v1437_v0 }
  0x58   : > { %306 = vst [vmem:[%s1643_s14 + $0x60] sm:$0xff] %v1437_v0 }
  0x59   : > { %307 = vst [vmem:[%s1643_s14 + $0x68] sm:$0xff] %v1437_v0 }
  0x5a   : > { %308 = vst [vmem:[%s1643_s14 + $0x70] sm:$0xff] %v1437_v0 }
  0x5b   : > { %309 = vst [vmem:[%s1643_s14 + $0x78] sm:$0xff] %v1437_v0 }
  0x5c PF: > { %v326_v1 = vld [vmem:[%s1630_s13 + $0x78] sm:$0xff]  ;;  %v325_v2 = vld [vmem:[%s1630_s13 + $0x70] sm:$0xff]  ;;  %v324_v3 = vld [vmem:[%s1630_s13 + $0x68] sm:$0xff]  ;;  %v327_v11 = vlaneseq  ;;  %v1438_v23 = vmov 1.0   ;;  %p951_p0 = scmp.ne.s32.totalorder %s1416_s21, 1 }
  0x5d   : > { %959 = vmatpush.msra.mxu2 %v326_v1  ;;  %960 = vmatpush.msra.mxu3 %v326_v1  ;;  %v323_v4 = vld [vmem:[%s1630_s13 + $0x60] sm:$0xff]  ;;  %v322_v5 = vld [vmem:[%s1630_s13 + $0x58] sm:$0xff]  ;;  %v321_v6 = vld [vmem:[%s1630_s13 + $0x50] sm:$0xff] }
  0x5e   : > { %409 = vmatpush.msra.mxu0 %v326_v1  ;;  %958 = vmatpush.msra.mxu1 %v326_v1  ;;  %v320_v7 = vld [vmem:[%s1630_s13 + $0x48] sm:$0xff]  ;;  %v319_v8 = vld [vmem:[%s1630_s13 + $0x40] sm:$0xff]  ;;  %v318_v9 = vld [vmem:[%s1630_s13 + $0x38] sm:$0xff]  ;;  %v1674_v14 = vshrl.u32 %v327_v11, 7 }
  0x5f   : > { %962 = vmatpush.msra.mxu2 %v325_v2  ;;  %963 = vmatpush.msra.mxu3 %v325_v2  ;;  %v317_v10 = vld [vmem:[%s1630_s13 + $0x30] sm:$0xff]  ;;  %v316_v12 = vld [vmem:[%s1630_s13 + $0x28] sm:$0xff]  ;;  %v315_v13 = vld [vmem:[%s1630_s13 + $0x20] sm:$0xff] }
  0x60   : > { %410 = vmatpush.msra.mxu0 %v325_v2  ;;  %961 = vmatpush.msra.mxu1 %v325_v2  ;;  %v314_v15 = vld [vmem:[%s1630_s13 + $0x18] sm:$0xff]  ;;  %v313_v16 = vld [vmem:[%s1630_s13 + $0x10] sm:$0xff]  ;;  %v336_v17 = vadd.s32 64, %v1674_v14  ;;  %v340_v19 = vadd.s32 96, %v1674_v14  ;;  %v312_v20 = vld [vmem:[%s1630_s13 + $0x8] sm:$0xff]  ;;  %v332_v21 = vadd.s32 32, %v1674_v14 }
  0x61   : > { %965 = vmatpush.msra.mxu2 %v324_v3  ;;  %966 = vmatpush.msra.mxu3 %v324_v3  ;;  %v1681_v18 = vld [vmem:[%s244_s0] ss:$0 sm:$0xff]  ;;  %v311_v22 = vld [vmem:[%s1630_s13] sm:$0xff]  ;;  %v337_v24 = vadd.s32 72, %v1674_v14  ;;  %v341_v25 = vadd.s32 104, %v1674_v14  ;;  %v329_v26 = vadd.s32 8, %v1674_v14 }
  0x62   : > { %411 = vmatpush.msra.mxu0 %v324_v3  ;;  %964 = vmatpush.msra.mxu1 %v324_v3  ;;  %vm353_vm0 = vcmp.eq.s32.totalorder %v336_v17, %v1681_v18  ;;  %vm357_vm1 = vcmp.eq.s32.totalorder %v340_v19, %v1681_v18  ;;  %vm345_vm2 = vcmp.eq.s32.totalorder %v1674_v14, %v1681_v18  ;;  %v333_v27 = vadd.s32 40, %v1674_v14  ;;  %v393_v36 = vld [vmem:[%s1643_s14] sm:$0xff]  ;;  %v394_v48 = vld [vmem:[%s1643_s14 + $0x8] sm:$0xff]  ;;  %v395_v60 = vld [vmem:[%s1643_s14 + $0x10] sm:$0xff] }
  0x63   : > { %968 = vmatpush.msra.mxu2 %v323_v4  ;;  %969 = vmatpush.msra.mxu3 %v323_v4  ;;  %vm349_vm3 = vcmp.eq.s32.totalorder %v332_v21, %v1681_v18  ;;  %vm354_vm4 = vcmp.eq.s32.totalorder %v337_v24, %v1681_v18  ;;  %vm358_vm5 = vcmp.eq.s32.totalorder %v341_v25, %v1681_v18  ;;  %v338_v28 = vadd.s32 80, %v1674_v14  ;;  %v397_v37 = vld [vmem:[%s1643_s14 + $0x20] sm:$0xff]  ;;  %v398_v49 = vld [vmem:[%s1643_s14 + $0x28] sm:$0xff]  ;;  %v399_v61 = vld [vmem:[%s1643_s14 + $0x30] sm:$0xff] }
  0x64   : > { %412 = vmatpush.msra.mxu0 %v323_v4  ;;  %967 = vmatpush.msra.mxu1 %v323_v4  ;;  %vm346_vm6 = vcmp.eq.s32.totalorder %v329_v26, %v1681_v18  ;;  %vm350_vm7 = vcmp.eq.s32.totalorder %v333_v27, %v1681_v18  ;;  %v342_v29 = vadd.s32 112, %v1674_v14  ;;  %v330_v30 = vadd.s32 16, %v1674_v14  ;;  %v401_v42 = vld [vmem:[%s1643_s14 + $0x40] sm:$0xff]  ;;  %v402_v54 = vld [vmem:[%s1643_s14 + $0x48] sm:$0xff]  ;;  %v403_v2 = vld [vmem:[%s1643_s14 + $0x50] sm:$0xff] }
  0x65   : > { %971 = vmatpush.msra.mxu2 %v322_v5  ;;  %972 = vmatpush.msra.mxu3 %v322_v5  ;;  %v334_v31 = vadd.s32 48, %v1674_v14  ;;  %vm355_vm8 = vcmp.eq.s32.totalorder %v338_v28, %v1681_v18  ;;  %v339_v32 = vadd.s32 88, %v1674_v14  ;;  %v343_v33 = vadd.s32 120, %v1674_v14  ;;  %v405_v43 = vld [vmem:[%s1643_s14 + $0x60] sm:$0xff]  ;;  %v406_v55 = vld [vmem:[%s1643_s14 + $0x68] sm:$0xff]  ;;  %v407_v3 = vld [vmem:[%s1643_s14 + $0x70] sm:$0xff] }
  0x66   : > { %413 = vmatpush.msra.mxu0 %v322_v5  ;;  %970 = vmatpush.msra.mxu1 %v322_v5  ;;  %vm359_vm9 = vcmp.eq.s32.totalorder %v342_v29, %v1681_v18  ;;  %vm347_vm10 = vcmp.eq.s32.totalorder %v330_v30, %v1681_v18  ;;  %v331_v34 = vadd.s32 24, %v1674_v14  ;;  %v335_v35 = vadd.s32 56, %v1674_v14  ;;  %v404_v14 = vld [vmem:[%s1643_s14 + $0x58] sm:$0xff] }
  0x67   : > { %974 = vmatpush.msra.mxu2 %v321_v6  ;;  %975 = vmatpush.msra.mxu3 %v321_v6  ;;  %vm351_vm11 = vcmp.eq.s32.totalorder %v334_v31, %v1681_v18  ;;  %vm356_vm12 = vcmp.eq.s32.totalorder %v339_v32, %v1681_v18  ;;  %vm360_vm13 = vcmp.eq.s32.totalorder %v343_v33, %v1681_v18 }
  0x68   : > { %414 = vmatpush.msra.mxu0 %v321_v6  ;;  %973 = vmatpush.msra.mxu1 %v321_v6  ;;  %vm348_vm14 = vcmp.eq.s32.totalorder %v331_v34, %v1681_v18  ;;  %vm352_vm15 = vcmp.eq.s32.totalorder %v335_v35, %v1681_v18 }
  0x69   : > { %977 = vmatpush.msra.mxu2 %v320_v7  ;;  %978 = vmatpush.msra.mxu3 %v320_v7 }
  0x6a   : > { %415 = vmatpush.msra.mxu0 %v320_v7  ;;  %976 = vmatpush.msra.mxu1 %v320_v7 }
  0x6b   : > { %980 = vmatpush.msra.mxu2 %v319_v8  ;;  %981 = vmatpush.msra.mxu3 %v319_v8 }
  0x6c   : > { %416 = vmatpush.msra.mxu0 %v319_v8  ;;  %979 = vmatpush.msra.mxu1 %v319_v8  ;;  %v396_v8 = vld [vmem:[%s1643_s14 + $0x18] sm:$0xff] }
  0x6d   : > { %983 = vmatpush.msra.mxu2 %v318_v9  ;;  %984 = vmatpush.msra.mxu3 %v318_v9 }
  0x6e   : > { %417 = vmatpush.msra.mxu0 %v318_v9  ;;  %982 = vmatpush.msra.mxu1 %v318_v9  ;;  %v400_v9 = vld [vmem:[%s1643_s14 + $0x38] sm:$0xff] }
  0x6f   : > { %986 = vmatpush.msra.mxu2 %v317_v10  ;;  %987 = vmatpush.msra.mxu3 %v317_v10 }
  0x70   : > { %418 = vmatpush.msra.mxu0 %v317_v10  ;;  %985 = vmatpush.msra.mxu1 %v317_v10 }
  0x71   : > { %989 = vmatpush.msra.mxu2 %v316_v12  ;;  %990 = vmatpush.msra.mxu3 %v316_v12 }
  0x72   : > { %419 = vmatpush.msra.mxu0 %v316_v12  ;;  %988 = vmatpush.msra.mxu1 %v316_v12 }
  0x73   : > { %992 = vmatpush.msra.mxu2 %v315_v13  ;;  %993 = vmatpush.msra.mxu3 %v315_v13 }
  0x74   : > { %420 = vmatpush.msra.mxu0 %v315_v13  ;;  %991 = vmatpush.msra.mxu1 %v315_v13 }
  0x75   : > { %995 = vmatpush.msra.mxu2 %v314_v15  ;;  %996 = vmatpush.msra.mxu3 %v314_v15 }
  0x76   : > { %421 = vmatpush.msra.mxu0 %v314_v15  ;;  %994 = vmatpush.msra.mxu1 %v314_v15  ;;  %v408_v15 = vld [vmem:[%s1643_s14 + $0x78] sm:$0xff] }
  0x77   : > { %998 = vmatpush.msra.mxu2 %v313_v16  ;;  %999 = vmatpush.msra.mxu3 %v313_v16 }
  0x78   : > { %422 = vmatpush.msra.mxu0 %v313_v16  ;;  %997 = vmatpush.msra.mxu1 %v313_v16 }
  0x79   : > { %1001 = vmatpush.msra.mxu2 %v312_v20  ;;  %1002 = vmatpush.msra.mxu3 %v312_v20 }
  0x7a   : > { %423 = vmatpush.msra.mxu0 %v312_v20  ;;  %1000 = vmatpush.msra.mxu1 %v312_v20 }
  0x7b   : > { %1004 = vmatpush.msra.mxu2 %v311_v22  ;;  %1005 = vmatpush.msra.mxu3 %v311_v22 }
  0x7c   : > { %943 = vmatmul.msk.f32.vlgmr.msra.gmra.mxu2 %vm353_vm0, %v1438_v23  ;;  %947 = vmatmul.msk.f32.vlgmr.msra.gmra.mxu3 %vm357_vm1, %v1438_v23 }
  0x7d   : > { %424 = vmatpush.msra.mxu0 %v311_v22  ;;  %1003 = vmatpush.msra.mxu1 %v311_v22 }
  0x7e   : > { %935 = vmatmul.msk.f32.vlgmr.msra.gmra.mxu0 %vm345_vm2, %v1438_v23  ;;  %939 = vmatmul.msk.f32.vlgmr.msra.gmra.mxu1 %vm349_vm3, %v1438_v23 }
  0x84   : > { %944 = vmatmul.msk.f32.gmra.mxu2 %vm354_vm4, %v1438_v23  ;;  %948 = vmatmul.msk.f32.gmra.mxu3 %vm358_vm5, %v1438_v23 }
  0x86   : > { %936 = vmatmul.msk.f32.gmra.mxu0 %vm346_vm6, %v1438_v23  ;;  %940 = vmatmul.msk.f32.gmra.mxu1 %vm350_vm7, %v1438_v23 }
  0x8c   : > { %945 = vmatmul.msk.f32.gmra.mxu2 %vm355_vm8, %v1438_v23  ;;  %949 = vmatmul.msk.f32.gmra.mxu3 %vm359_vm9, %v1438_v23 }
  0x8e   : > { %937 = vmatmul.msk.f32.gmra.mxu0 %vm347_vm10, %v1438_v23  ;;  %941 = vmatmul.msk.f32.gmra.mxu1 %vm351_vm11, %v1438_v23 }
  0x94   : > { %946 = vmatmul.msk.f32.gmra.mxu2 %vm356_vm12, %v1438_v23  ;;  %950 = vmatmul.msk.f32.gmra.mxu3 %vm360_vm13, %v1438_v23 }
  0x96   : > { %938 = vmatmul.msk.f32.gmra.mxu0 %vm348_vm14, %v1438_v23  ;;  %942 = vmatmul.msk.f32.gmra.mxu1 %vm352_vm15, %v1438_v23 }
  0xfb   : > { %v426_v38 = vpop.f32.mrf.mxu0  ;;  %v438_v39 = vpop.f32.mrf.mxu1 }
  0xfc   : > { %v474_v40 = vadd.f32 %v426_v38, %v393_v36  ;;  %v478_v41 = vadd.f32 %v438_v39, %v397_v37 }
  0xfe   : > { %490 = vst [vmem:[%s1643_s14] sm:$0xff] %v474_v40 }
  0xff   : > { %494 = vst [vmem:[%s1643_s14 + $0x20] sm:$0xff] %v478_v41  ;;  %v450_v44 = vpop.f32.mrf.mxu2  ;;  %v462_v45 = vpop.f32.mrf.mxu3 }
 0x100   : > { %v482_v46 = vadd.f32 %v450_v44, %v401_v42  ;;  %v486_v47 = vadd.f32 %v462_v45, %v405_v43 }
 0x102   : > { %498 = vst [vmem:[%s1643_s14 + $0x40] sm:$0xff] %v482_v46 }
 0x103   : > { %502 = vst [vmem:[%s1643_s14 + $0x60] sm:$0xff] %v486_v47  ;;  %v429_v50 = vpop.f32.mrf.mxu0  ;;  %v441_v51 = vpop.f32.mrf.mxu1 }
 0x104   : > { %v475_v52 = vadd.f32 %v429_v50, %v394_v48  ;;  %v479_v53 = vadd.f32 %v441_v51, %v398_v49 }
 0x106   : > { %491 = vst [vmem:[%s1643_s14 + $0x8] sm:$0xff] %v475_v52 }
 0x107   : > { %495 = vst [vmem:[%s1643_s14 + $0x28] sm:$0xff] %v479_v53  ;;  %v453_v56 = vpop.f32.mrf.mxu2  ;;  %v465_v57 = vpop.f32.mrf.mxu3 }
 0x108   : > { %v483_v58 = vadd.f32 %v453_v56, %v402_v54  ;;  %v487_v59 = vadd.f32 %v465_v57, %v406_v55 }
 0x10a   : > { %499 = vst [vmem:[%s1643_s14 + $0x48] sm:$0xff] %v483_v58 }
 0x10b   : > { %503 = vst [vmem:[%s1643_s14 + $0x68] sm:$0xff] %v487_v59  ;;  %v432_v62 = vpop.f32.mrf.mxu0  ;;  %v444_v63 = vpop.f32.mrf.mxu1 }
 0x10c   : > { %v476_v0 = vadd.f32 %v432_v62, %v395_v60  ;;  %v480_v1 = vadd.f32 %v444_v63, %v399_v61 }
 0x10e   : > { %492 = vst [vmem:[%s1643_s14 + $0x10] sm:$0xff] %v476_v0 }
 0x10f   : > { %496 = vst [vmem:[%s1643_s14 + $0x30] sm:$0xff] %v480_v1  ;;  %v456_v4 = vpop.f32.mrf.mxu2  ;;  %v468_v5 = vpop.f32.mrf.mxu3 }
 0x110   : > { %v484_v6 = vadd.f32 %v456_v4, %v403_v2  ;;  %v488_v7 = vadd.f32 %v468_v5, %v407_v3 }
 0x112   : > { %500 = vst [vmem:[%s1643_s14 + $0x50] sm:$0xff] %v484_v6 }
 0x113   : > { %504 = vst [vmem:[%s1643_s14 + $0x70] sm:$0xff] %v488_v7  ;;  %v435_v10 = vpop.f32.mrf.mxu0  ;;  %v447_v11 = vpop.f32.mrf.mxu1 }
 0x114   : > { %v477_v12 = vadd.f32 %v435_v10, %v396_v8  ;;  %v481_v13 = vadd.f32 %v447_v11, %v400_v9 }
 0x116   : > { %493 = vst [vmem:[%s1643_s14 + $0x18] sm:$0xff] %v477_v12 }
 0x117   : > { %497 = vst [vmem:[%s1643_s14 + $0x38] sm:$0xff] %v481_v13  ;;  %v459_v16 = vpop.f32.mrf.mxu2  ;;  %v471_v17 = vpop.f32.mrf.mxu3  ;;  %509 = sbr.rel (%p951_p0) target bundleno = 502 (0x1f6), region = 56 }
 0x118   : > { %v485_v18 = vadd.f32 %v459_v16, %v404_v14  ;;  %v489_v19 = vadd.f32 %v471_v17, %v408_v15 }
 0x11a   : > { %501 = vst [vmem:[%s1643_s14 + $0x58] sm:$0xff] %v485_v18 }
 0x11b   : > { %505 = vst [vmem:[%s1643_s14 + $0x78] sm:$0xff] %v489_v19 }
 0x11c   : > { %v541_v20 = vld [vmem:[#allocation7 + $0x78] sm:$0xff]  ;;  %v540_v21 = vld [vmem:[#allocation7 + $0x70] sm:$0xff]  ;;  %v539_v22 = vld [vmem:[#allocation7 + $0x68] sm:$0xff] }
 0x11d   : > { %546 = vmatpush.msra.mxu0 %v541_v20  ;;  %1006 = vmatpush.msra.mxu1 %v541_v20  ;;  %v538_v23 = vld [vmem:[#allocation7 + $0x60] sm:$0xff]  ;;  %v537_v24 = vld [vmem:[#allocation7 + $0x58] sm:$0xff]  ;;  %v536_v25 = vld [vmem:[#allocation7 + $0x50] sm:$0xff] }
 0x11e   : > { %1007 = vmatpush.msra.mxu2 %v541_v20  ;;  %1008 = vmatpush.msra.mxu3 %v541_v20  ;;  %v535_v26 = vld [vmem:[#allocation7 + $0x48] sm:$0xff]  ;;  %v534_v27 = vld [vmem:[#allocation7 + $0x40] sm:$0xff]  ;;  %v533_v28 = vld [vmem:[#allocation7 + $0x38] sm:$0xff] }
 0x11f   : > { %547 = vmatpush.msra.mxu0 %v540_v21  ;;  %1009 = vmatpush.msra.mxu1 %v540_v21  ;;  %v532_v29 = vld [vmem:[#allocation7 + $0x30] sm:$0xff]  ;;  %v531_v30 = vld [vmem:[#allocation7 + $0x28] sm:$0xff]  ;;  %v530_v31 = vld [vmem:[#allocation7 + $0x20] sm:$0xff] }
 0x120   : > { %1010 = vmatpush.msra.mxu2 %v540_v21  ;;  %1011 = vmatpush.msra.mxu3 %v540_v21  ;;  %v529_v32 = vld [vmem:[#allocation7 + $0x18] sm:$0xff]  ;;  %v528_v33 = vld [vmem:[#allocation7 + $0x10] sm:$0xff]  ;;  %v527_v34 = vld [vmem:[#allocation7 + $0x8] sm:$0xff] }
 0x121   : > { %548 = vmatpush.msra.mxu0 %v539_v22  ;;  %1012 = vmatpush.msra.mxu1 %v539_v22  ;;  %v526_v35 = vld [vmem:[#allocation7] sm:$0xff]  ;;  %v511_v40 = vld [vmem:[%s1643_s14 + $0x8] sm:$0xff]  ;;  %v512_v44 = vld [vmem:[%s1643_s14 + $0x10] sm:$0xff] }
 0x122   : > { %1013 = vmatpush.msra.mxu2 %v539_v22  ;;  %1014 = vmatpush.msra.mxu3 %v539_v22  ;;  %v510_v36 = vld [vmem:[%s1643_s14] sm:$0xff]  ;;  %v515_v41 = vld [vmem:[%s1643_s14 + $0x28] sm:$0xff]  ;;  %v516_v45 = vld [vmem:[%s1643_s14 + $0x30] sm:$0xff] }
 0x123   : > { %549 = vmatpush.msra.mxu0 %v538_v23  ;;  %1015 = vmatpush.msra.mxu1 %v538_v23  ;;  %v514_v37 = vld [vmem:[%s1643_s14 + $0x20] sm:$0xff]  ;;  %v519_v42 = vld [vmem:[%s1643_s14 + $0x48] sm:$0xff]  ;;  %v520_v46 = vld [vmem:[%s1643_s14 + $0x50] sm:$0xff] }
 0x124   : > { %1016 = vmatpush.msra.mxu2 %v538_v23  ;;  %1017 = vmatpush.msra.mxu3 %v538_v23  ;;  %v518_v38 = vld [vmem:[%s1643_s14 + $0x40] sm:$0xff]  ;;  %v523_v43 = vld [vmem:[%s1643_s14 + $0x68] sm:$0xff]  ;;  %v524_v47 = vld [vmem:[%s1643_s14 + $0x70] sm:$0xff] }
 0x125   : > { %550 = vmatpush.msra.mxu0 %v537_v24  ;;  %1018 = vmatpush.msra.mxu1 %v537_v24  ;;  %v522_v39 = vld [vmem:[%s1643_s14 + $0x60] sm:$0xff]  ;;  %v513_v48 = vld [vmem:[%s1643_s14 + $0x18] sm:$0xff] }
 0x126   : > { %1019 = vmatpush.msra.mxu2 %v537_v24  ;;  %1020 = vmatpush.msra.mxu3 %v537_v24  ;;  %v517_v49 = vld [vmem:[%s1643_s14 + $0x38] sm:$0xff] }
 0x127   : > { %551 = vmatpush.msra.mxu0 %v536_v25  ;;  %1021 = vmatpush.msra.mxu1 %v536_v25  ;;  %v521_v50 = vld [vmem:[%s1643_s14 + $0x58] sm:$0xff] }
 0x128   : > { %1022 = vmatpush.msra.mxu2 %v536_v25  ;;  %1023 = vmatpush.msra.mxu3 %v536_v25  ;;  %v525_v51 = vld [vmem:[%s1643_s14 + $0x78] sm:$0xff] }
 0x129   : > { %552 = vmatpush.msra.mxu0 %v535_v26  ;;  %1024 = vmatpush.msra.mxu1 %v535_v26  ;;  %v1768_v52 = vld [vmem:[%s1943_s3] ss:$0 sm:$0xff] }
 0x12a   : > { %1025 = vmatpush.msra.mxu2 %v535_v26  ;;  %1026 = vmatpush.msra.mxu3 %v535_v26 }
 0x12b   : > { %553 = vmatpush.msra.mxu0 %v534_v27  ;;  %1027 = vmatpush.msra.mxu1 %v534_v27 }
 0x12c   : > { %1028 = vmatpush.msra.mxu2 %v534_v27  ;;  %1029 = vmatpush.msra.mxu3 %v534_v27 }
 0x12d   : > { %554 = vmatpush.msra.mxu0 %v533_v28  ;;  %1030 = vmatpush.msra.mxu1 %v533_v28 }
 0x12e   : > { %1031 = vmatpush.msra.mxu2 %v533_v28  ;;  %1032 = vmatpush.msra.mxu3 %v533_v28 }
 0x12f   : > { %555 = vmatpush.msra.mxu0 %v532_v29  ;;  %1033 = vmatpush.msra.mxu1 %v532_v29 }
 0x130   : > { %1034 = vmatpush.msra.mxu2 %v532_v29  ;;  %1035 = vmatpush.msra.mxu3 %v532_v29 }
 0x131   : > { %556 = vmatpush.msra.mxu0 %v531_v30  ;;  %1036 = vmatpush.msra.mxu1 %v531_v30 }
 0x132   : > { %1037 = vmatpush.msra.mxu2 %v531_v30  ;;  %1038 = vmatpush.msra.mxu3 %v531_v30 }
 0x133   : > { %557 = vmatpush.msra.mxu0 %v530_v31  ;;  %1039 = vmatpush.msra.mxu1 %v530_v31 }
 0x134   : > { %1040 = vmatpush.msra.mxu2 %v530_v31  ;;  %1041 = vmatpush.msra.mxu3 %v530_v31 }
 0x135   : > { %558 = vmatpush.msra.mxu0 %v529_v32  ;;  %1042 = vmatpush.msra.mxu1 %v529_v32 }
 0x136   : > { %1043 = vmatpush.msra.mxu2 %v529_v32  ;;  %1044 = vmatpush.msra.mxu3 %v529_v32 }
 0x137   : > { %559 = vmatpush.msra.mxu0 %v528_v33  ;;  %1045 = vmatpush.msra.mxu1 %v528_v33 }
 0x138   : > { %1046 = vmatpush.msra.mxu2 %v528_v33  ;;  %1047 = vmatpush.msra.mxu3 %v528_v33 }
 0x139   : > { %560 = vmatpush.msra.mxu0 %v527_v34  ;;  %1048 = vmatpush.msra.mxu1 %v527_v34 }
 0x13a   : > { %1049 = vmatpush.msra.mxu2 %v527_v34  ;;  %1050 = vmatpush.msra.mxu3 %v527_v34 }
 0x13b   : > { %561 = vmatpush.msra.mxu0 %v526_v35  ;;  %1051 = vmatpush.msra.mxu1 %v526_v35 }
 0x13c   : > { %1052 = vmatpush.msra.mxu2 %v526_v35  ;;  %1053 = vmatpush.msra.mxu3 %v526_v35 }
 0x13d   : > { %562 = vmatmul.f32.vlgmr.msra.gmra.mxu0 %v510_v36  ;;  %574 = vmatmul.f32.vlgmr.msra.gmra.mxu1 %v514_v37 }
 0x13e   : > { %586 = vmatmul.f32.vlgmr.msra.gmra.mxu2 %v518_v38  ;;  %598 = vmatmul.f32.vlgmr.msra.gmra.mxu3 %v522_v39 }
 0x145   : > { %565 = vmatmul.f32.gmra.mxu0 %v511_v40  ;;  %577 = vmatmul.f32.gmra.mxu1 %v515_v41 }
 0x146   : > { %589 = vmatmul.f32.gmra.mxu2 %v519_v42  ;;  %601 = vmatmul.f32.gmra.mxu3 %v523_v43 }
 0x14d   : > { %568 = vmatmul.f32.gmra.mxu0 %v512_v44  ;;  %580 = vmatmul.f32.gmra.mxu1 %v516_v45 }
 0x14e   : > { %592 = vmatmul.f32.gmra.mxu2 %v520_v46  ;;  %604 = vmatmul.f32.gmra.mxu3 %v524_v47 }
 0x155   : > { %571 = vmatmul.f32.gmra.mxu0 %v513_v48  ;;  %583 = vmatmul.f32.gmra.mxu1 %v517_v49 }
 0x156   : > { %595 = vmatmul.f32.gmra.mxu2 %v521_v50  ;;  %607 = vmatmul.f32.gmra.mxu3 %v525_v51 }
 0x1ba   : > { %v563_v53 = vpop.f32.mrf.mxu0  ;;  %v575_v54 = vpop.f32.mrf.mxu1 }
 0x1bb   : > { %v564_v55 = vadd.f32 %v1768_v52, %v563_v53  ;;  %v576_v56 = vadd.f32 %v1768_v52, %v575_v54 }
 0x1bd   : > { %v627_v57 = vmul.f32 0.044715, %v564_v55  ;;  %v631_v58 = vmul.f32 0.044715, %v576_v56  ;;  %v611_v29 = vmul.f32 0.5, %v564_v55  ;;  %v615_v30 = vmul.f32 0.5, %v576_v56 }
 0x1bf   : > { %v643_v59 = vmul.f32 %v627_v57, %v564_v55  ;;  %v647_v60 = vmul.f32 %v631_v58, %v576_v56 }
 0x1c1   : > { %v659_v61 = vmul.f32 %v643_v59, %v564_v55  ;;  %v663_v62 = vmul.f32 %v647_v60, %v576_v56  ;;  %v587_v63 = vpop.f32.mrf.mxu2  ;;  %v599_v0 = vpop.f32.mrf.mxu3 }
 0x1c2   : > { %v588_v1 = vadd.f32 %v1768_v52, %v587_v63  ;;  %v600_v2 = vadd.f32 %v1768_v52, %v599_v0  ;;  %v566_v3 = vpop.f32.mrf.mxu0  ;;  %v578_v4 = vpop.f32.mrf.mxu1 }
 0x1c3   : > { %v675_v5 = vadd.f32 %v659_v61, %v564_v55  ;;  %v679_v6 = vadd.f32 %v663_v62, %v576_v56  ;;  %v1775_v7 = vadd.f32 %v1768_v52, %v566_v3  ;;  %v1778_v8 = vadd.f32 %v1768_v52, %v578_v4 }
 0x1c4   : > { %v635_v9 = vmul.f32 0.044715, %v588_v1  ;;  %v639_v10 = vmul.f32 0.044715, %v600_v2  ;;  %v619_v38 = vmul.f32 0.5, %v588_v1  ;;  %v623_v54 = vmul.f32 0.5, %v600_v2 }
 0x1c5   : > { %v691_v11 = vmul.f32 0.7978846, %v675_v5  ;;  %v695_v12 = vmul.f32 0.7978846, %v679_v6  ;;  %v628_v15 = vmul.f32 0.044715, %v1775_v7 }
 0x1c6   : > { %v651_v13 = vmul.f32 %v635_v9, %v588_v1  ;;  %v655_v14 = vmul.f32 %v639_v10, %v600_v2  ;;  %v632_v16 = vmul.f32 0.044715, %v1778_v8  ;;  %v612_v0 = vmul.f32 0.5, %v1775_v7 }
 0x1c7   : > { %1180 = vtanh.f32 %v691_v11  ;;  %v644_v19 = vmul.f32 %v628_v15, %v1775_v7 }
 0x1c8   : > { %1182 = vtanh.f32 %v695_v12  ;;  %v667_v17 = vmul.f32 %v651_v13, %v588_v1  ;;  %v671_v18 = vmul.f32 %v655_v14, %v600_v2  ;;  %v648_v20 = vmul.f32 %v632_v16, %v1778_v8 }
 0x1c9   : > { %v590_v21 = vpop.f32.mrf.mxu2  ;;  %v602_v22 = vpop.f32.mrf.mxu3  ;;  %v660_v25 = vmul.f32 %v644_v19, %v1775_v7 }
 0x1ca   : > { %v683_v23 = vadd.f32 %v667_v17, %v588_v1  ;;  %v687_v24 = vadd.f32 %v671_v18, %v600_v2  ;;  %v1786_v26 = vadd.f32 %v1768_v52, %v590_v21  ;;  %v569_v27 = vpop.f32.mrf.mxu0  ;;  %v581_v28 = vpop.f32.mrf.mxu1  ;;  %v664_v31 = vmul.f32 %v648_v20, %v1778_v8 }
 0x1cb   : > { %v1790_v32 = vadd.f32 %v1768_v52, %v602_v22  ;;  %v676_v35 = vadd.f32 %v660_v25, %v1775_v7  ;;  %v1794_v36 = vadd.f32 %v1768_v52, %v569_v27  ;;  %v1800_v45 = vadd.f32 %v1768_v52, %v581_v28 }
 0x1cc   : > { %v699_v33 = vmul.f32 0.7978846, %v683_v23  ;;  %v703_v34 = vmul.f32 0.7978846, %v687_v24  ;;  %v680_v39 = vadd.f32 %v664_v31, %v1778_v8  ;;  %v636_v40 = vmul.f32 0.044715, %v1786_v26 }
 0x1cd   : > { %v1181_v37 = vpop.eup %1180  ;;  %v640_v41 = vmul.f32 0.044715, %v1790_v32  ;;  %v692_v44 = vmul.f32 0.7978846, %v676_v35  ;;  %v629_v51 = vmul.f32 0.044715, %v1794_v36 }
 0x1ce   : > { %v1183_v42 = vpop.eup %1182  ;;  %v723_v43 = vadd.f32 1.0, %v1181_v37  ;;  %1184 = vtanh.f32 %v699_v33  ;;  %v696_v47 = vmul.f32 0.7978846, %v680_v39  ;;  %v652_v48 = vmul.f32 %v636_v40, %v1786_v26 }
 0x1cf   : > { %v727_v46 = vadd.f32 1.0, %v1183_v42  ;;  %1186 = vtanh.f32 %v703_v34  ;;  %v656_v50 = vmul.f32 %v640_v41, %v1790_v32  ;;  %v645_v59 = vmul.f32 %v629_v51, %v1794_v36 }
 0x1d0   : > { %v739_v49 = vmul.f32 %v723_v43, %v611_v29  ;;  %1188 = vtanh.f32 %v692_v44  ;;  %v668_v55 = vmul.f32 %v652_v48, %v1786_v26  ;;  %v633_v60 = vmul.f32 0.044715, %v1800_v45 }
 0x1d1   : > { %v743_v53 = vmul.f32 %v727_v46, %v615_v30  ;;  %1190 = vtanh.f32 %v696_v47  ;;  %v593_v56 = vpop.f32.mrf.mxu2  ;;  %v605_v57 = vpop.f32.mrf.mxu3  ;;  %v672_v58 = vmul.f32 %v656_v50, %v1790_v32  ;;  %v616_v1 = vmul.f32 0.5, %v1778_v8 }
 0x1d2   : > { %755 = vst [vmem:[%s1643_s14] sm:$0xff] %v739_v49  ;;  %v1811_v61 = vadd.f32 %v1768_v52, %v593_v56  ;;  %v572_v62 = vpop.f32.mrf.mxu0  ;;  %v584_v63 = vpop.f32.mrf.mxu1  ;;  %v684_v2 = vadd.f32 %v668_v55, %v1786_v26  ;;  %v1818_v3 = vadd.f32 %v1768_v52, %v605_v57  ;;  %v661_v6 = vmul.f32 %v645_v59, %v1794_v36 }
 0x1d3   : > { %759 = vst [vmem:[%s1643_s14 + $0x20] sm:$0xff] %v743_v53  ;;  %v688_v5 = vadd.f32 %v672_v58, %v1790_v32  ;;  %v649_v9 = vmul.f32 %v633_v60, %v1800_v45  ;;  %v1824_v10 = vadd.f32 %v1768_v52, %v572_v62  ;;  %v1828_v13 = vadd.f32 %v1768_v52, %v584_v63 }
 0x1d4   : > { %v1185_v4 = vpop.eup %1184  ;;  %v700_v7 = vmul.f32 0.7978846, %v684_v2  ;;  %v637_v8 = vmul.f32 0.044715, %v1811_v61  ;;  %v677_v17 = vadd.f32 %v661_v6, %v1794_v36  ;;  %v641_v30 = vmul.f32 0.044715, %v1818_v3 }
 0x1d5   : > { %v1187_v11 = vpop.eup %1186  ;;  %v731_v12 = vadd.f32 1.0, %v1185_v4  ;;  %v704_v16 = vmul.f32 0.7978846, %v688_v5  ;;  %v665_v18 = vmul.f32 %v649_v9, %v1800_v45  ;;  %v630_v34 = vmul.f32 0.044715, %v1824_v10 }
 0x1d6   : > { %v1189_v14 = vpop.eup %1188  ;;  %v735_v15 = vadd.f32 1.0, %v1187_v11  ;;  %1192 = vtanh.f32 %v700_v7  ;;  %v653_v22 = vmul.f32 %v637_v8, %v1811_v61  ;;  %v693_v25 = vmul.f32 0.7978846, %v677_v17 }
 0x1d7   : > { %v1191_v19 = vpop.eup %1190  ;;  %v747_v20 = vmul.f32 %v731_v12, %v619_v38  ;;  %v724_v21 = vadd.f32 1.0, %v1189_v14  ;;  %1194 = vtanh.f32 %v704_v16  ;;  %v681_v28 = vadd.f32 %v665_v18, %v1800_v45 }
 0x1d8   : > { %v751_v23 = vmul.f32 %v735_v15, %v623_v54  ;;  %v728_v24 = vadd.f32 1.0, %v1191_v19  ;;  %v669_v29 = vmul.f32 %v653_v22, %v1811_v61  ;;  %1196 = vtanh.f32 %v693_v25 }
 0x1d9   : > { %763 = vst [vmem:[%s1643_s14 + $0x40] sm:$0xff] %v747_v20  ;;  %v740_v27 = vmul.f32 %v724_v21, %v612_v0  ;;  %v596_v31 = vpop.f32.mrf.mxu2  ;;  %v697_v35 = vmul.f32 0.7978846, %v681_v28  ;;  %v657_v38 = vmul.f32 %v641_v30, %v1818_v3  ;;  %v608_v39 = vpop.f32.mrf.mxu3  ;;  %v620_v40 = vmul.f32 0.5, %v1786_v26 }
 0x1da   : > { %767 = vst [vmem:[%s1643_s14 + $0x60] sm:$0xff] %v751_v23  ;;  %v744_v33 = vmul.f32 %v728_v24, %v616_v1  ;;  %v685_v37 = vadd.f32 %v669_v29, %v1811_v61  ;;  %v646_v41 = vmul.f32 %v630_v34, %v1824_v10  ;;  %v634_v42 = vmul.f32 0.044715, %v1828_v13 }
 0x1db   : > { %756 = vst [vmem:[%s1643_s14 + $0x8] sm:$0xff] %v740_v27  ;;  %v1847_v43 = vadd.f32 %v1768_v52, %v596_v31  ;;  %v624_v46 = vmul.f32 0.5, %v1790_v32  ;;  %1198 = vtanh.f32 %v697_v35  ;;  %v673_v48 = vmul.f32 %v657_v38, %v1818_v3 }
 0x1dc   : > { %760 = vst [vmem:[%s1643_s14 + $0x28] sm:$0xff] %v744_v33  ;;  %v1193_v44 = vpop.eup %1192  ;;  %v701_v47 = vmul.f32 0.7978846, %v685_v37  ;;  %v662_v51 = vmul.f32 %v646_v41, %v1824_v10  ;;  %v650_v26 = vmul.f32 %v634_v42, %v1828_v13  ;;  %v1854_v53 = vadd.f32 %v1768_v52, %v608_v39 }
 0x1dd   : > { %v1195_v49 = vpop.eup %1194  ;;  %v732_v50 = vadd.f32 1.0, %v1193_v44  ;;  %v689_v55 = vadd.f32 %v673_v48, %v1818_v3  ;;  %v638_v32 = vmul.f32 0.044715, %v1847_v43  ;;  %v613_v58 = vmul.f32 0.5, %v1794_v36 }
 0x1de   : > { %v736_v54 = vadd.f32 1.0, %v1195_v49  ;;  %1200 = vtanh.f32 %v701_v47  ;;  %v1197_v56 = vpop.eup %1196  ;;  %v678_v59 = vadd.f32 %v662_v51, %v1824_v10  ;;  %v666_v60 = vmul.f32 %v650_v26, %v1828_v13 }
 0x1df   : > { %v748_v57 = vmul.f32 %v732_v50, %v620_v40  ;;  %v725_v63 = vadd.f32 1.0, %v1197_v56  ;;  %v705_v0 = vmul.f32 0.7978846, %v689_v55  ;;  %v654_v52 = vmul.f32 %v638_v32, %v1847_v43 }
 0x1e0   : > { %v752_v62 = vmul.f32 %v736_v54, %v624_v46  ;;  %v694_v1 = vmul.f32 0.7978846, %v678_v59  ;;  %v682_v2 = vadd.f32 %v666_v60, %v1828_v13  ;;  %v642_v4 = vmul.f32 0.044715, %v1854_v53 }
 0x1e1   : > { %764 = vst [vmem:[%s1643_s14 + $0x48] sm:$0xff] %v748_v57  ;;  %v1199_v5 = vpop.eup %1198  ;;  %v741_v6 = vmul.f32 %v725_v63, %v613_v58  ;;  %v617_v36 = vmul.f32 0.5, %v1800_v45  ;;  %1202 = vtanh.f32 %v705_v0  ;;  %v670_v9 = vmul.f32 %v654_v52, %v1847_v43 }
 0x1e2   : > { %768 = vst [vmem:[%s1643_s14 + $0x68] sm:$0xff] %v752_v62  ;;  %v729_v11 = vadd.f32 1.0, %v1199_v5  ;;  %1204 = vtanh.f32 %v694_v1  ;;  %v698_v12 = vmul.f32 0.7978846, %v682_v2  ;;  %v658_v7 = vmul.f32 %v642_v4, %v1854_v53 }
 0x1e3   : > { %757 = vst [vmem:[%s1643_s14 + $0x10] sm:$0xff] %v741_v6  ;;  %v621_v14 = vmul.f32 0.5, %v1811_v61  ;;  %v686_v15 = vadd.f32 %v670_v9, %v1847_v43  ;;  %v625_v61 = vmul.f32 0.5, %v1818_v3  ;;  %v614_v25 = vmul.f32 0.5, %v1824_v10 }
 0x1e4   : > { %v1201_v8 = vpop.eup %1200  ;;  %v745_v16 = vmul.f32 %v729_v11, %v617_v36  ;;  %1206 = vtanh.f32 %v698_v12  ;;  %v674_v45 = vmul.f32 %v658_v7, %v1854_v53  ;;  %v618_v31 = vmul.f32 0.5, %v1828_v13 }
 0x1e5   : > { %v733_v17 = vadd.f32 1.0, %v1201_v8  ;;  %v702_v18 = vmul.f32 0.7978846, %v686_v15  ;;  %v622_v3 = vmul.f32 0.5, %v1847_v43  ;;  %v626_v39 = vmul.f32 0.5, %v1854_v53 }
 0x1e6   : > { %761 = vst [vmem:[%s1643_s14 + $0x30] sm:$0xff] %v745_v16  ;;  %v690_v20 = vadd.f32 %v674_v45, %v1854_v53 }
 0x1e7   : > { %v749_v19 = vmul.f32 %v733_v17, %v621_v14  ;;  %v1203_v21 = vpop.eup %1202  ;;  %1208 = vtanh.f32 %v702_v18 }
 0x1e8   : > { %v1205_v22 = vpop.eup %1204  ;;  %v737_v23 = vadd.f32 1.0, %v1203_v21  ;;  %v706_v24 = vmul.f32 0.7978846, %v690_v20 }
 0x1e9   : > { %765 = vst [vmem:[%s1643_s14 + $0x50] sm:$0xff] %v749_v19  ;;  %v726_v27 = vadd.f32 1.0, %v1205_v22 }
 0x1ea   : > { %v1207_v28 = vpop.eup %1206  ;;  %v753_v29 = vmul.f32 %v737_v23, %v625_v61  ;;  %1210 = vtanh.f32 %v706_v24 }
 0x1eb   : > { %v742_v30 = vmul.f32 %v726_v27, %v614_v25  ;;  %v730_v33 = vadd.f32 1.0, %v1207_v28 }
 0x1ec   : > { %769 = vst [vmem:[%s1643_s14 + $0x70] sm:$0xff] %v753_v29 }
 0x1ed   : > { %v1209_v34 = vpop.eup %1208  ;;  %758 = vst [vmem:[%s1643_s14 + $0x18] sm:$0xff] %v742_v30  ;;  %v746_v35 = vmul.f32 %v730_v33, %v618_v31 }
 0x1ee   : > { %v734_v37 = vadd.f32 1.0, %v1209_v34 }
 0x1ef   : > { %762 = vst [vmem:[%s1643_s14 + $0x38] sm:$0xff] %v746_v35 }
 0x1f0   : > { %v1211_v38 = vpop.eup %1210  ;;  %v750_v10 = vmul.f32 %v734_v37, %v622_v3 }
 0x1f1   : > { %v738_v40 = vadd.f32 1.0, %v1211_v38 }
 0x1f2   : > { %766 = vst [vmem:[%s1643_s14 + $0x58] sm:$0xff] %v750_v10 }
 0x1f3   : > { %v754_v41 = vmul.f32 %v738_v40, %v626_v39 }
 0x1f5   : > { %770 = vst [vmem:[%s1643_s14 + $0x78] sm:$0xff] %v754_v41 }
 0x1f6 PF: > { %s1977_s7 = sld [smem:[#allocation15_spill]]  ;;  %s784_s28 = sshll.u32 %s1643_s14, 4  ;;  %s785_s28 = int_to_ptr.vmem [resolvable:$true] %s784_s28 }
 0x1f7   : > { %s1979_s4 = sld [smem:[#allocation24_spill]]  ;;  %s772_s22 = scalar_lea.sflag [#allocation4], %s286_s18 }
 0x1fc   : > { %s957_s2 = sshll.u32 %s1977_s7, 7 }
 0x1fd   : > { %s783_s15 = scalar_lea.hbm %s1979_s4, %s957_s2  ;;  %s1322_s20 = scalar_lea.hbm %s1979_s4, 256 }
 0x1fe   : > { %s786_s5 = sshll.u32 %s783_s15, 4  ;;  %s787_s5 = int_to_ptr.hbm [resolvable:$true] %s786_s5 }
 0x1ff   : > { %s1316_s8 = sshra.s32 %s787_s5, 4  ;;  %s1317_s8 = int_to_ptr.hbm [resolvable:$true] %s1316_s8 }
 0x200   : > { %s1318_s29 = scalar_lea.hbm %s1317_s8, 128  ;;  %p1323_p3 = scmp.lt.s32.totalorder %s1317_s8, %s1979_s4 }
 0x201   : > { %p1319_p13 = scmp.ne.s32.totalorder %s1317_s8, %s1318_s29  ;;  %p1324_p4 = scmp.lt.s32.totalorder %s1322_s20, %s1318_s29 }
 0x203   : > { %p1320_p1 = pnand %p1319_p13, %p1532_p6  ;;  %p1325_p5 = por %p1324_p4, %p1323_p3 }
 0x205   : > { %p1321_p2 = pneg %p1320_p1 }
 0x207   : > { %p1326_p7 = pnand %p1325_p5, %p1321_p2 }
 0x209   : > { %1329 = shalt.err (!%p1326_p7)
}
 0x20a   : > { %s1439_s13 = smov 128   ;;  %s1440_s18 = smov 8  }
 0x20b   : > { %1062 = dma.vmem_to_hbm [thread:$0]  (%p1532_p6), %s785_s28, 2048, %s787_s5, %s772_s22, %s1439_s13, %s1439_s13, %s1440_s18  }
 0x20c PF: > { %s1980_s27 = sld [smem:[#allocation13_spill]]  ;;  %p1082_p10 = scmp.ge.s32.totalorder %s1432_s25, 2 }
 0x20e   : > { %p1076_p11 = pnand %p1082_p10, %p1537_p8 }
 0x210   : > { %p1077_p12 = pneg %p1076_p11 }
 0x212   : > { %s801_s21 = sand.u32 1, %s1980_s27  }
 0x213   : > { %s802_s26 = scalar_lea.sflag [#allocation4], %s801_s21 }
 0x214   : > { %1387 = dma.done.wait (%p1077_p12), %s802_s26, 2048  }
 0x215   : > { %1389 = vsyncadd (%p1077_p12), %s802_s26, 4294965248  ;;  %s23_s25 = sadd.s32 1, %s1432_s25   ;;  %s1982_s7 = sld [smem:[#allocation20_spill]] }
 0x216   : > { %p20_p9 = scmp.ge.s32.totalorder %s23_s25, 6   ;;  %s1983_s6 = sld [smem:[#allocation14_spill]] }
 0x217   : > { %s1984_s20 = sld [smem:[#allocation21_spill]]  ;;  %s1987_s15 = smov %s1396_s16 }
 0x218   : > { %s1985_s2 = sld [smem:[#allocation18_spill]]  ;;  %s1988_s16 = smov %s1400_s17 }
 0x219   : > { %s1986_s12 = sld [smem:[#allocation19_spill]]  ;;  %s1990_s18 = smov %s1408_s19 }
 0x21a   : > { %s1992_s21 = smov %s1424_s23  ;;  %s1993_s22 = smov %s1428_s24 }
 0x21b   : > { %s1989_s17 = smov %s1982_s7  ;;  %22 = sbr.rel (!%p20_p9) target bundleno = 15 (0xf), region = 106 }
 0x21c   : > { %s1991_s19 = smov %s1983_s6 }
 0x21e   : > { %s1994_s23 = smov %s1985_s2 }
 0x21f   : > { %s1995_s24 = smov %s1986_s12 }
 0x220   :  { %808 = vsyncpa [#allocation3], 1 }
 0x221   :  { %810 = vsyncpa [#allocation3 + $0x1], 1 }
 0x222   :  { %811 = vsyncpa [#allocation6], 1 }
 0x223   :  { %813 = vsyncpa [#allocation6 + $0x1], 1 }
 0x224   :  { %814 = vsyncpa [#allocation4], 1 }
 0x225   :  { %816 = vsyncpa [#allocation4 + $0x1], 1 }

</bundles_post_ra>
